<compile_context>
chip_gen: v6e
topology: v6e:2x2x1
jax: 0.10.0
libtpu: 0.0.40
codegen_flags: <defaults>
</compile_context>

<pallas_src>
import functools

import jax
import jax.numpy as jnp
from jax.experimental import pallas as pl
from jax.experimental.pallas import tpu as pltpu

# packed per-row coefficient columns: [A, B, Gw, 0, ...]
_P_A, _P_B, _P_GW = 0, 1, 2
_PRM_W = 8


def _round_up(v, m):
    return (v + m - 1) // m * m


def _vmem_capacity_bytes():
    try:
        return int(pltpu.get_tpu_info().vmem_capacity_bytes)
    except Exception:
        return 64 << 20  # conservative default (v7x per-TensorCore size)


# --------------------------------------------------------------------------------------
# Standard path: full L per block, fused stats + affine in one pass.
# --------------------------------------------------------------------------------------
def _bin_gate_kernel(x_ref, prm_ref, o_ref, *, eps, inv_l):
    # x_ref:   (TR, L)   rows = (n, c) pairs, lanes = flattened H*W
    # prm_ref: (TR, 8)   per-row fused coefficients [A, B, Gw, 0...]
    x = x_ref[...].astype(jnp.float32)
    A = prm_ref[:, _P_A:_P_A + 1]
    B = prm_ref[:, _P_B:_P_B + 1]
    Gw = prm_ref[:, _P_GW:_P_GW + 1]

    # two-pass per-row instance-norm stats (numerically robust; x is VMEM-resident)
    mu = jnp.sum(x, axis=-1, keepdims=True) * inv_l
    xc = x - mu
    var = jnp.sum(xc * xc, axis=-1, keepdims=True) * inv_l
    s = Gw * jax.lax.rsqrt(var + eps)  # per-row scalar; rsqrt rides the EUP slot

    # out = gate*BN(x) + (1-gate)*IN(x) == A*x + s*(x - mu) + B
    o_ref[...] = (A * x + s * xc + B).astype(o_ref.dtype)


# --------------------------------------------------------------------------------------
# L-chunked path (very large H*W): pass 1 = per-row stats -> final scale/offset,
# pass 2 = streaming affine apply.
# --------------------------------------------------------------------------------------
def _stats_kernel(x_ref, prm_ref, coef_ref, shift_sc, s1_sc, s2_sc,
                  *, eps, inv_l, l_total, tl):
    k = pl.program_id(1)
    x = x_ref[...].astype(jnp.float32)

    @pl.when(k == 0)
    def _init():
        shift_sc[...] = x[:, 0:1]          # per-row shift for cancellation-safe single pass
        s1_sc[...] = jnp.zeros_like(s1_sc)
        s2_sc[...] = jnp.zeros_like(s2_sc)

    col = jax.lax.broadcasted_iota(jnp.int32, x.shape, 1) + k * tl
    valid = col < l_total                  # mask padded lanes of the tail L-chunk
    xs = jnp.where(valid, x - shift_sc[...], 0.0)
    s1_sc[...] = s1_sc[...] + jnp.sum(xs, axis=-1, keepdims=True)
    s2_sc[...] = s2_sc[...] + jnp.sum(xs * xs, axis=-1, keepdims=True)

    @pl.when(k == pl.num_programs(1) - 1)
    def _finalize():
        A = prm_ref[:, _P_A:_P_A + 1]
        B = prm_ref[:, _P_B:_P_B + 1]
        Gw = prm_ref[:, _P_GW:_P_GW + 1]
        m = s1_sc[...] * inv_l
        var = jnp.maximum(s2_sc[...] * inv_l - m * m, 0.0)
        mu = m + shift_sc[...]
        s = Gw * jax.lax.rsqrt(var + eps)
        coef_ref[...] = jnp.zeros(coef_ref.shape, jnp.float32)
        coef_ref[:, 0:1] = A + s           # fused scale
        coef_ref[:, 1:2] = B - s * mu      # fused offset


def _apply_kernel(x_ref, coef_ref, o_ref):
    scale = coef_ref[:, 0:1]
    off = coef_ref[:, 1:2]
    o_ref[...] = (scale * x_ref[...].astype(jnp.float32) + off).astype(o_ref.dtype)


# --------------------------------------------------------------------------------------
# Wrapper
# --------------------------------------------------------------------------------------
def meta_bin_gate_ver2(x, bn_w, bn_b, bn_rm, bn_rv, in_w, in_b, gate, *,
                       eps=1e-5, in_fc_multiply=0.0,
                       _force_chunked=False, _force_tl=None):
    """x: (N, C, H, W) float32. Per-channel params: shape (C,)."""
    N, C, H, W = x.shape
    R, L = N * C, H * W
    x2 = x.reshape(R, L)

    # ---- host-side fusion of BN + gate affine algebra into per-channel coeffs ----
    f32 = jnp.float32
    a1 = bn_w.astype(f32) * jax.lax.rsqrt(bn_rv.astype(f32) + eps)   # bn scale
    b1 = bn_b.astype(f32) - bn_rm.astype(f32) * a1                   # bn offset
    g = gate.astype(f32)
    if H == 1:
        # Meta_in_norm H==1 path (module checks shape[2]==1 twice): IN branch is
        # x * IN_FC_MULTIPLY with no IN affine.
        A_c = g * a1 + (1.0 - g) * f32(in_fc_multiply)
        B_c = g * b1
        Gw_c = jnp.zeros_like(g)
    else:
        A_c = g * a1
        B_c = g * b1 + (1.0 - g) * in_b.astype(f32)
        Gw_c = (1.0 - g) * in_w.astype(f32)

    prm_c = jnp.stack([A_c, B_c, Gw_c] + [jnp.zeros_like(g)] * (_PRM_W - 3), axis=1)  # (C, 8)
    prm = jnp.tile(prm_c, (N, 1))                                                     # (R, 8)

    # ---- generation-aware tile sizing with lane-padding-aware VMEM accounting ----
    L_pad = _round_up(L, 128)          # lanes actually occupied by an x/out row in VMEM
    row_bytes = L_pad * 4
    prm_row_bytes = 128 * 4            # (TR, 8) f32 block is laid out as (TR, 128) in VMEM

    vmem_cap = _vmem_capacity_bytes()
    big_vmem = vmem_cap >= (100 << 20)                    # v5e/v6e: 128 MiB; v7x: 64 MiB
    target_block_bytes = (8 << 20) if big_vmem else (4 << 20)
    vmem_ceiling = (96 << 20) if big_vmem else (38 << 20)

    R8 = _round_up(R, 8)

    # does a minimal (TR=8, full-L) block fit under the ceiling (double-buffered in+out+prm)?
    min_vmem = 4 * 8 * row_bytes + 2 * 8 * prm_row_bytes
    use_chunked = bool(_force_chunked) or (min_vmem + (6 << 20) > vmem_ceiling)

    if not use_chunked:
        # -------------------- single-kernel fused path --------------------
        TR = max(8, (target_block_bytes // row_bytes) // 8 * 8)
        # guarantee enough pipelined grid steps (>= 2 per TensorCore on v7x, ~8 when R allows)
        if R8 >= 64:
            cap = max(8, (R8 // 8) // 8 * 8)
        elif R8 >= 16:
            cap = max(8, (R8 // 2) // 8 * 8)
        else:
            cap = R8
        TR = min(TR, cap, R8)
        grid = (pl.cdiv(R, TR),)          # no host pad / output slice; tail block is masked

        blk = TR * row_bytes
        vmem_need = 4 * blk + 2 * TR * prm_row_bytes      # in + out double-buffered + prm
        vmem_limit = int(min(max(vmem_need + (6 << 20), 24 << 20), vmem_ceiling))

        cost = pl.CostEstimate(
            flops=7 * R * L,
            transcendentals=R,
            bytes_accessed=2 * R * L * 4 + R * _PRM_W * 4,
        )

        kernel = functools.partial(_bin_gate_kernel, eps=float(eps), inv_l=1.0 / L)
        out2d = pl.pallas_call(
            kernel,
            out_shape=jax.ShapeDtypeStruct((R, L), x.dtype),
            grid_spec=pltpu.PrefetchScalarGridSpec(
                num_scalar_prefetch=0,
                grid=grid,
                in_specs=[
                    pl.BlockSpec((TR, L), lambda i: (i, 0)),
                    pl.BlockSpec((TR, _PRM_W), lambda i: (i, 0)),
                ],
                out_specs=pl.BlockSpec((TR, L), lambda i: (i, 0)),
            ),
            compiler_params=pltpu.CompilerParams(
                dimension_semantics=("parallel",),
                vmem_limit_bytes=vmem_limit,
            ),
            cost_estimate=cost,
        )(x2, prm)
        return out2d.reshape(N, C, H, W)

    # -------------------- L-chunked two-kernel path (huge H*W) --------------------
    TL = max(128, (target_block_bytes // (8 * 4)) // 128 * 128)
    if _force_tl is not None:
        TL = int(_force_tl)
    TL = min(TL, L_pad)
    if TL >= L:
        TL = L                                            # block == full last dim (always legal)
    TR = max(8, (target_block_bytes // (TL * 4)) // 8 * 8)
    TR = min(TR, R8)
    n_r = pl.cdiv(R, TR)
    n_l = pl.cdiv(L, TL)

    blk = TR * _round_up(TL, 128) * 4
    prm_blk = TR * prm_row_bytes
    vmem_stats = 2 * blk + 4 * prm_blk + 3 * prm_blk      # x(2) + prm(2) + coef(2) + 3 scratch
    vmem_apply = 4 * blk + 2 * prm_blk
    vmem_limit = int(min(max(max(vmem_stats, vmem_apply) + (6 << 20), 24 << 20), vmem_ceiling))

    stats_kernel = functools.partial(
        _stats_kernel, eps=float(eps), inv_l=1.0 / L, l_total=L, tl=TL)
    coef = pl.pallas_call(
        stats_kernel,
        out_shape=jax.ShapeDtypeStruct((R, _PRM_W), jnp.float32),
        grid_spec=pltpu.PrefetchScalarGridSpec(
            num_scalar_prefetch=0,
            grid=(n_r, n_l),
            in_specs=[
                pl.BlockSpec((TR, TL), lambda i, k: (i, k)),
                pl.BlockSpec((TR, _PRM_W), lambda i, k: (i, 0)),
            ],
            out_specs=pl.BlockSpec((TR, _PRM_W), lambda i, k: (i, 0)),
            scratch_shapes=[pltpu.VMEM((TR, 1), jnp.float32)] * 3,
        ),
        compiler_params=pltpu.CompilerParams(
            dimension_semantics=("parallel", "arbitrary"),
            vmem_limit_bytes=vmem_limit,
        ),
        cost_estimate=pl.CostEstimate(
            flops=5 * R * L, transcendentals=R,
            bytes_accessed=R * L * 4 + 2 * R * _PRM_W * 4),
    )(x2, prm)

    out2d = pl.pallas_call(
        _apply_kernel,
        out_shape=jax.ShapeDtypeStruct((R, L), x.dtype),
        grid_spec=pltpu.PrefetchScalarGridSpec(
            num_scalar_prefetch=0,
            grid=(n_r, n_l),
            in_specs=[
                pl.BlockSpec((TR, TL), lambda i, k: (i, k)),
                pl.BlockSpec((TR, _PRM_W), lambda i, k: (i, 0)),
            ],
            out_specs=pl.BlockSpec((TR, TL), lambda i, k: (i, k)),
        ),
        compiler_params=pltpu.CompilerParams(
            dimension_semantics=("parallel", "parallel"),
            vmem_limit_bytes=vmem_limit,
        ),
        cost_estimate=pl.CostEstimate(
            flops=2 * R * L, transcendentals=0,
            bytes_accessed=2 * R * L * 4 + R * _PRM_W * 4),
    )(x2, coef)
    return out2d.reshape(N, C, H, W)


# --------------------------------------------------------------------------------------
# Pure-JAX reference (mirrors the PyTorch forward, eval mode, opt=None, H > 1)
# --------------------------------------------------------------------------------------
def _reference(x, bn_w, bn_b, bn_rm, bn_rv, in_w, in_b, gate, eps=1e-5):
    out1 = (x - bn_rm[None, :, None, None]) / jnp.sqrt(bn_rv[None, :, None, None] + eps)
    out1 = out1 * bn_w[None, :, None, None] + bn_b[None, :, None, None]
    mu = jnp.mean(x, axis=(2, 3), keepdims=True)
    var = jnp.mean((x - mu) ** 2, axis=(2, 3), keepdims=True)
    out2 = (x - mu) / jnp.sqrt(var + eps)
    out2 = out2 * in_w[None, :, None, None] + in_b[None, :, None, None]
    g = gate[None, :, None, None]
    return out1 * g + out2 * (1.0 - g)


if __name__ == "__main__":
    key = jax.random.PRNGKey(0)
    k1, k2 = jax.random.split(key, 2)

    # ---- test 1: primary shape, single-block path ----
    N, C, H, W = 2, 4, 16, 16
    x = jax.random.normal(k1, (N, C, H, W), dtype=jnp.float32)

    # Deterministic params matching the module init (affine w=1, b=0; BIN_INIT='half' -> 0.5),
    # with perturbed BN running stats to exercise the eval-BN path.
    bn_w = jnp.ones((C,), jnp.float32)
    bn_b = jnp.zeros((C,), jnp.float32)
    bn_rm = 0.1 * jnp.arange(C, dtype=jnp.float32)
    bn_rv = 1.0 + 0.05 * jnp.arange(C, dtype=jnp.float32)
    in_w = jnp.ones((C,), jnp.float32)
    in_b = jnp.zeros((C,), jnp.float32)
    gate = jnp.full((C,), 0.5, jnp.float32)

    out = meta_bin_gate_ver2(x, bn_w, bn_b, bn_rm, bn_rv, in_w, in_b, gate)
    out = jax.block_until_ready(out)
    ref = _reference(x, bn_w, bn_b, bn_rm, bn_rv, in_w, in_b, gate)
    assert out.shape == (N, C, H, W)
    assert jnp.allclose(out, ref, atol=1e-5, rtol=1e-5), "mismatch vs reference (path 1)"

    # ---- test 2: multi-block row grid with a masked partial tail (R = 15, no host pad) ----
    N2, C2 = 3, 5
    x_b = jax.random.normal(k2, (N2, C2, H, W), dtype=jnp.float32)
    bn_w2 = 1.0 + 0.05 * jnp.arange(C2, dtype=jnp.float32)
    bn_b2 = 0.01 * jnp.arange(C2, dtype=jnp.float32)
    bn_rm2 = 0.1 * jnp.arange(C2, dtype=jnp.float32)
    bn_rv2 = 1.0 + 0.03 * jnp.arange(C2, dtype=jnp.float32)
    in_w2 = 1.0 - 0.02 * jnp.arange(C2, dtype=jnp.float32)
    in_b2 = 0.03 * jnp.arange(C2, dtype=jnp.float32)
    gate2 = jnp.linspace(0.1, 0.9, C2, dtype=jnp.float32)

    out_b = meta_bin_gate_ver2(x_b, bn_w2, bn_b2, bn_rm2, bn_rv2, in_w2, in_b2, gate2)
    out_b = jax.block_until_ready(out_b)
    ref_b = _reference(x_b, bn_w2, bn_b2, bn_rm2, bn_rv2, in_w2, in_b2, gate2)
    assert jnp.allclose(out_b, ref_b, atol=1e-5, rtol=1e-5), "mismatch vs reference (path 2)"

    # ---- test 3: forced L-chunked two-kernel path (stats + apply) at small shape ----
    out_c = meta_bin_gate_ver2(x, bn_w, bn_b, bn_rm, bn_rv, in_w, in_b, gate,
                               _force_chunked=True, _force_tl=128)
    out_c = jax.block_until_ready(out_c)
    assert jnp.allclose(out_c, ref, atol=1e-5, rtol=1e-5), "mismatch vs reference (chunked path)"

    print("KERNEL_OK")
</pallas_src>

<mosaic_0001>
module attributes {stable_mosaic.version = 11 : i64} {
  func.func @_bin_gate_kernel(%arg0: i32, %arg1: memref<8x256xf32, #tpu.memory_space<vmem>>, %arg2: memref<8x8xf32, #tpu.memory_space<vmem>>, %arg3: memref<8x256xf32, #tpu.memory_space<vmem>>) attributes {dimension_semantics = [#tpu.dimension_semantics<parallel>], iteration_bounds = array<i64: 1>, scalar_prefetch = 0 : i64, scratch_operands = 0 : i64, tpu.core_type = #tpu.core_type<tc>, window_params = [{transform_indices = @transform_0, window_bounds = array<i64: 8, 256>}, {transform_indices = @transform_1, window_bounds = array<i64: 8, 8>}, {transform_indices = @transform_2, window_bounds = array<i64: 8, 256>}]} {
    %c0 = arith.constant 0 : index
    %c0_0 = arith.constant 0 : index
    %0 = vector.load %arg1[%c0, %c0_0] : memref<8x256xf32, #tpu.memory_space<vmem>>, vector<8x256xf32>
    %c0_1 = arith.constant 0 : index
    %c0_2 = arith.constant 0 : index
    %1 = vector.load %arg2[%c0_1, %c0_2] : memref<8x8xf32, #tpu.memory_space<vmem>>, vector<8x1xf32>
    %c0_3 = arith.constant 0 : index
    %c1 = arith.constant 1 : index
    %2 = vector.load %arg2[%c0_3, %c1] : memref<8x8xf32, #tpu.memory_space<vmem>>, vector<8x1xf32>
    %c0_4 = arith.constant 0 : index
    %c2 = arith.constant 2 : index
    %3 = vector.load %arg2[%c0_4, %c2] : memref<8x8xf32, #tpu.memory_space<vmem>>, vector<8x1xf32>
    %cst = arith.constant dense<0.000000e+00> : vector<8xf32>
    %4 = vector.multi_reduction <add>, %0, %cst [1] : vector<8x256xf32> to vector<8xf32>
    %5 = vector.shape_cast %4 : vector<8xf32> to vector<8x1xf32>
    %cst_5 = arith.constant 3.906250e-03 : f32
    %6 = vector.broadcast %cst_5 : f32 to vector<8x1xf32>
    %7 = arith.mulf %5, %6 : vector<8x1xf32>
    %8 = vector.broadcast %7 : vector<8x1xf32> to vector<8x256xf32>
    %9 = arith.subf %0, %8 : vector<8x256xf32>
    %10 = arith.mulf %9, %9 : vector<8x256xf32>
    %cst_6 = arith.constant dense<0.000000e+00> : vector<8xf32>
    %11 = vector.multi_reduction <add>, %10, %cst_6 [1] : vector<8x256xf32> to vector<8xf32>
    %12 = vector.shape_cast %11 : vector<8xf32> to vector<8x1xf32>
    %cst_7 = arith.constant 3.906250e-03 : f32
    %13 = vector.broadcast %cst_7 : f32 to vector<8x1xf32>
    %14 = arith.mulf %12, %13 : vector<8x1xf32>
    %cst_8 = arith.constant 9.99999974E-6 : f32
    %15 = vector.broadcast %cst_8 : f32 to vector<8x1xf32>
    %16 = arith.addf %14, %15 : vector<8x1xf32>
    %17 = math.rsqrt %16 : vector<8x1xf32>
    %18 = arith.mulf %3, %17 : vector<8x1xf32>
    %19 = vector.broadcast %1 : vector<8x1xf32> to vector<8x256xf32>
    %20 = arith.mulf %19, %0 : vector<8x256xf32>
    %21 = vector.broadcast %18 : vector<8x1xf32> to vector<8x256xf32>
    %22 = arith.mulf %21, %9 : vector<8x256xf32>
    %23 = arith.addf %20, %22 : vector<8x256xf32>
    %24 = vector.broadcast %2 : vector<8x1xf32> to vector<8x256xf32>
    %25 = arith.addf %23, %24 : vector<8x256xf32>
    %c0_9 = arith.constant 0 : index
    %c0_10 = arith.constant 0 : index
    %26 = vector.load %arg3[%c0_9, %c0_10] : memref<8x256xf32, #tpu.memory_space<vmem>>, vector<8x256xf32>
    tpu.vector_store %arg3[%c0_9, %c0_10], %25 {strides = array<i32>} : memref<8x256xf32, #tpu.memory_space<vmem>>, vector<8x256xf32>,
    return
  }
  func.func @transform_0(%arg0: i32) -> (i32, i32) {
    %c0_i32 = arith.constant 0 : i32
    %c0_i32_0 = arith.constant 0 : i32
    return %arg0, %c0_i32 : i32, i32
  }
  func.func @transform_1(%arg0: i32) -> (i32, i32) {
    %c0_i32 = arith.constant 0 : i32
    %c0_i32_0 = arith.constant 0 : i32
    return %arg0, %c0_i32 : i32, i32
  }
  func.func @transform_2(%arg0: i32) -> (i32, i32) {
    %c0_i32 = arith.constant 0 : i32
    %c0_i32_0 = arith.constant 0 : i32
    return %arg0, %c0_i32 : i32, i32
  }
}

</mosaic_0001>

<bundles_post_ra>
// kernel: tpu_custom_call.1
= control target key start
LH: loop header
LB: loop body
LE: loop exit
PB: predicated region body
PF: predicated region fallthrough
CT: control target
= control target key end

     0   :  { %7 = vsyncpa [#allocation3], 0  ;;  %s201_s0 = inlined_call_operand.hbm [shape: f32[8,256], index: 0, kind: input, shape index: {}]   ;;  %s202_s1 = inlined_call_operand.hbm [shape: f32[8,8], index: 1, kind: input, shape index: {}]   ;;  %s203_s2 = inlined_call_operand.hbm [shape: f32[8,256], index: 2, kind: output, shape index: {}]  }
   0x1   :  { %8 = vsyncpa [#allocation6], 0 }
   0x2   :  { %9 = vsyncpa [#allocation4], 0  ;;  %s171_s9 = smov [#allocation2]   ;;  %s172_s11 = smov [#allocation5]  }
   0x3   :  { %s16_s10 = sshll.u32 %s171_s9, 4  ;;  %s26_s12 = sshll.u32 %s172_s11, 4  ;;  %s17_s10 = int_to_ptr.vmem [resolvable:$true] %s16_s10  ;;  %s27_s12 = int_to_ptr.vmem [resolvable:$true] %s26_s12 }
   0x4   :  { %s113_s13 = scalar_lea.vmem %s17_s10, 256  ;;  %p118_p1 = scmp.lt.s32.totalorder %s17_s10, %s17_s10 }
   0x5   :  { %p114_p0 = scmp.ne.s32.totalorder %s17_s10, %s113_s13  ;;  %p119_p2 = scmp.lt.s32.totalorder %s113_s13, %s113_s13 }
   0x7   :  { %p120_p3 = por %p119_p2, %p118_p1 }
   0x9   :  { %p121_p4 = pnand %p120_p3, %p114_p0 }
   0xb   :  { %124 = shalt.err (!%p121_p4)
}
   0xc   :  { %19 = dma.hbm_to_vmem [thread:$0]  %s201_s0, 256, %s17_s10, [#allocation3]  }
   0xd   :  { %s133_s16 = scalar_lea.vmem %s27_s12, 128  ;;  %p138_p6 = scmp.lt.s32.totalorder %s27_s12, %s27_s12 }
   0xe   :  { %p134_p5 = scmp.ne.s32.totalorder %s27_s12, %s133_s16  ;;  %p139_p7 = scmp.lt.s32.totalorder %s133_s16, %s133_s16 }
  0x10   :  { %p140_p8 = por %p139_p7, %p138_p6 }
  0x12   :  { %p141_p9 = pnand %p140_p8, %p134_p5 }
  0x14   :  { %144 = shalt.err (!%p141_p9)
}
  0x15   :  { %29 = dma.hbm_to_vmem [thread:$0]  %s202_s1, 128, %s27_s12, [#allocation6]  }
  0x16   :  { %165 = dma.done.wait [#allocation3], 256  }
  0x17   :  { %166 = vsyncadd [#allocation3], 4294967040 }
  0x18   :  { %167 = dma.done.wait [#allocation6], 128  }
  0x19   :  { %168 = vsyncadd [#allocation6], 4294967168  ;;  %v36_v0 = vld [vmem:[#allocation2] sm:$0xff]  ;;  %v37_v1 = vld [vmem:[#allocation2 + $0x8] sm:$0xff]  ;;  %v173_v11 = vmov 0   ;;  %v174_v12 = vmov 2  }
  0x1a   :  { %v39_v2 = vadd.f32 %v37_v1, %v36_v0  ;;  %v38_v10 = vld [vmem:[#allocation5] sm:$0xff]  ;;  %100 = vset.pattern.permute.xlu1 %v173_v11  ;;  %v175_v13 = vmov 1   ;;  %s176_s0 = smov [#allocation7]  }
  0x1b   :  { %56 = vperm.xlu1 %100, %v38_v10   ;;  %102 = vset.pattern.permute.xlu0 %v175_v13  ;;  %s84_s1 = sshll.u32 %s176_s0, 4  ;;  %s85_s1 = int_to_ptr.vmem [resolvable:$true] %s84_s1 }
  0x1c   :  { %40 = vadd.xlane.f32.xlu0 %v39_v2  ;;  %s145_s19 = scalar_lea.vmem %s85_s1, 256  ;;  %p150_p11 = scmp.lt.s32.totalorder %s85_s1, %s85_s1 }
  0x1d   :  { %p146_p10 = scmp.ne.s32.totalorder %s85_s1, %s145_s19  ;;  %p151_p12 = scmp.lt.s32.totalorder %s145_s19, %s145_s19 }
  0x1f   :  { %101 = vset.pattern.permute.xlu1 %v174_v12  ;;  %p152_p13 = por %p151_p12, %p150_p11 }
  0x21   :  { %p153_p0 = pnand %p152_p13, %p146_p10 }
  0x96   :  { %v57_v19 = vpop.permute.xlu1 %56 }
  0x97   :  { %v59_v21 = vmul.f32 %v57_v19, %v36_v0  ;;  %v60_v22 = vmul.f32 %v57_v19, %v37_v1 }
  0xa5   :  { %v41_v3 = vpop.xlane.xlu0 %40 }
  0xa6   :  { %v42_v4 = vmul.f32 0.00390625, %v41_v3 }
  0xa8   :  { %v43_v5 = vsub.f32 %v36_v0, %v42_v4  ;;  %v44_v6 = vsub.f32 %v37_v1, %v42_v4 }
  0xaa   :  { %v45_v7 = vmul.f32 %v43_v5, %v43_v5  ;;  %v46_v8 = vmul.f32 %v44_v6, %v44_v6 }
  0xac   :  { %v47_v9 = vadd.f32 %v46_v8, %v45_v7 }
  0xae   :  { %48 = vadd.xlane.f32.xlu0 %v47_v9 }
  0xc4   :  { %71 = vperm.xlu0 %102, %v38_v10  }
 0x137   :  { %v49_v14 = vpop.xlane.xlu0 %48 }
 0x138   :  { %v50_v15 = vmul.f32 0.00390625, %v49_v14 }
 0x13a   :  { %v51_v16 = vadd.f32 1e-05, %v50_v15 }
 0x13c   :  { %103 = vrsqrt.f32 %v51_v16 }
 0x13f   :  { %v72_v25 = vpop.permute.xlu0 %71 }
 0x149   :  { %v104_v17 = vpop.eup %103 }
 0x14a   :  { %v53_v18 = vmul.f32 %v104_v17, %v38_v10 }
 0x14c   :  { %63 = vperm.xlu1 %101, %v53_v18  }
 0x1c7   :  { %v64_v20 = vpop.permute.xlu1 %63 }
 0x1c8   :  { %v66_v23 = vmul.f32 %v64_v20, %v43_v5  ;;  %v67_v24 = vmul.f32 %v64_v20, %v44_v6 }
 0x1ca   :  { %v68_v26 = vadd.f32 %v66_v23, %v59_v21  ;;  %v69_v27 = vadd.f32 %v67_v24, %v60_v22 }
 0x1cc   :  { %v74_v28 = vadd.f32 %v72_v25, %v68_v26  ;;  %v75_v29 = vadd.f32 %v72_v25, %v69_v27 }
 0x1ce   :  { %76 = vst [vmem:[#allocation7] sm:$0xff] %v74_v28  ;;  %77 = vst [vmem:[#allocation7 + $0x8] sm:$0xff] %v75_v29 }
 0x1cf   :  { %156 = shalt.err (!%p153_p0)
}
 0x1d0   :  { %87 = dma.vmem_to_hbm [thread:$0]  %s85_s1, 256, %s203_s2, [#allocation4]  }
 0x1d1   :  { %169 = dma.done.wait [#allocation4], 256  }
 0x1d2   :  { %170 = vsyncadd [#allocation4], 4294967040 }
 0x1d3   :  { %91 = vsyncpa [#allocation3], 1 }
 0x1d4   :  { %92 = vsyncpa [#allocation6], 1 }
 0x1d5   :  { %93 = vsyncpa [#allocation4], 1 }

</bundles_post_ra>
